<compile_context>
chip_gen: v5e
topology: v5e:2x2
jax: 0.10.0
libtpu: 0.0.40
codegen_flags: <defaults>
</compile_context>

<pallas_src>
import math

import jax
import jax.numpy as jnp
from jax.experimental import pallas as pl
from jax.experimental.pallas import tpu as pltpu

LANE = 128          # TPU lane width; final-layer logits padded 20 -> 128
OUT_DIM = 20        # valid logits / softmax size (action_dim)
MAX_M_TILE = 2048   # max batch rows per grid step (~6 MiB VMEM, fits every gen)
ALIGN = 16          # row alignment legal for both f32 (8,128) and bf16 (16,128)


def _cdiv(a, b):
    return -(-a // b)


def _round_up(a, m):
    return _cdiv(a, m) * m


def policy_mlp_kernel(s_ref, l_ref, w1s_ref, w1l_ref, w2_ref, w21_ref,
                      w22_ref, w23_ref, w3_ref, bias_ref, o_ref):
    """One (tile, :) batch slab: 6 dense layers (ReLU on first 5) + lane softmax."""
    bias = bias_ref[...]              # (8, 128) f32; rows 0..5 = b1,b2,b21,b22,b23,b3

    def dense(x, w_ref, row, relu=True):
        # bf16 MXU operands, f32 accumulation, f32 bias add.
        y = jnp.dot(x.astype(w_ref.dtype), w_ref[...],
                    preferred_element_type=jnp.float32)
        y = y + bias[row:row + 1, :y.shape[-1]]
        return jnp.maximum(y, 0.0) if relu else y

    # fc1 with the torch.cat fused away: dot(s, W1s) + dot(l, W1l) + b1
    h = (jnp.dot(s_ref[...], w1s_ref[...], preferred_element_type=jnp.float32)
         + jnp.dot(l_ref[...], w1l_ref[...], preferred_element_type=jnp.float32)
         + bias[0:1, :])
    h = jnp.maximum(h, 0.0)                      # relu1          -> 128
    h = dense(h, w2_ref, 1)                      # fc2  + relu2   -> 128
    h = dense(h, w21_ref, 2)                     # fc21 + relu21  -> 128
    h = dense(h, w22_ref, 3)                     # fc22 + relu22  -> 32
    h = dense(h, w23_ref, 4)                     # fc23 + relu23  -> 32
    logits = dense(h, w3_ref, 5, relu=False)     # fc3            -> 128 (20 valid)

    # Softmax over the 20 valid lanes; exp(-inf) is exactly 0 on padded lanes.
    col = jax.lax.broadcasted_iota(jnp.int32, logits.shape, 1)
    masked = jnp.where(col < OUT_DIM, logits, -jnp.inf)
    m = jnp.max(masked, axis=-1, keepdims=True)
    e = jnp.exp(masked - m)
    s = jnp.sum(e, axis=-1, keepdims=True)
    o_ref[...] = (e / s).astype(o_ref.dtype)     # exact normalization, bf16 store


def init_params(key, state_dim, embedding_dim):
    """PyTorch-style U(-1/sqrt(fan_in), 1/sqrt(fan_in)) init.

    Returns ((f32 weights, f32 biases), kernel_params) where kernel_params is
    (w1_state, w1_latent, w2, w21, w22, w23, w3_padded, bias_pack) with bf16
    weights (stored (in, out)) and a single (8, 128) f32 packed bias buffer.
    """
    d_in = state_dim + embedding_dim
    dims = [(d_in, 128), (128, 128), (128, 128), (128, 32), (32, 32), (32, OUT_DIM)]
    ws_f32, bs_f32 = [], []
    for fi, fo in dims:
        key, kw, kb = jax.random.split(key, 3)
        bound = 1.0 / math.sqrt(fi)
        ws_f32.append(jax.random.uniform(kw, (fi, fo), jnp.float32, -bound, bound))
        bs_f32.append(jax.random.uniform(kb, (fo,), jnp.float32, -bound, bound))

    w1s = ws_f32[0][:state_dim].astype(jnp.bfloat16)     # (state_dim, 128)
    w1l = ws_f32[0][state_dim:].astype(jnp.bfloat16)     # (embedding_dim, 128)
    w2 = ws_f32[1].astype(jnp.bfloat16)                  # (128, 128)
    w21 = ws_f32[2].astype(jnp.bfloat16)                 # (128, 128)
    w22 = ws_f32[3].astype(jnp.bfloat16)                 # (128, 32)
    w23 = ws_f32[4].astype(jnp.bfloat16)                 # (32, 32)
    w3 = (jnp.zeros((32, LANE), jnp.float32)
          .at[:, :OUT_DIM].set(ws_f32[5])
          .astype(jnp.bfloat16))                         # (32, 128), 20 valid cols

    bias = jnp.zeros((8, LANE), jnp.float32)             # packed biases, rows 0..5
    for r, b in enumerate(bs_f32):
        bias = bias.at[r, :b.shape[0]].set(b)

    kernel_params = (w1s, w1l, w2, w21, w22, w23, w3, bias)
    return (ws_f32, bs_f32), kernel_params


def policy_forward_batched(states, latent_codes, params):
    """states: (B, state_dim), latent_codes: (B, embedding_dim) -> (B, 20) f32."""
    B, sd = states.shape
    ed = latent_codes.shape[1]
    w1s, w1l, w2, w21, w22, w23, w3, bias = params

    # Adaptive tile: big tiles for big batches, but >= 2 tiles when B > ALIGN so
    # both v7x TensorCores get work; tiny batches get a single small tile.
    tile = min(MAX_M_TILE, _round_up(max(_cdiv(B, 2), 1), ALIGN))
    n_tiles = _cdiv(B, tile)
    b_pad = n_tiles * tile

    # One fused pass per input: f32 -> bf16 cast (halves kernel input DMA) +
    # tail pad (at most one tile's worth of rows).  No concatenate.
    def prep(x):
        x = x.astype(jnp.bfloat16)
        if b_pad != B:
            x = jnp.pad(x, ((0, b_pad - B), (0, 0)))
        return x

    s_p = prep(states)
    l_p = prep(latent_codes)

    act_specs = [pl.BlockSpec((tile, sd), lambda i: (i, 0)),
                 pl.BlockSpec((tile, ed), lambda i: (i, 0))]
    # Constant index_maps -> weights/bias DMA'd once, VMEM-resident across tiles.
    w_specs = [pl.BlockSpec(p.shape, lambda i: (0, 0))
               for p in (w1s, w1l, w2, w21, w22, w23, w3, bias)]

    out = pl.pallas_call(
        policy_mlp_kernel,
        out_shape=jax.ShapeDtypeStruct((b_pad, LANE), jnp.bfloat16),
        grid=(n_tiles,),
        in_specs=act_specs + w_specs,
        out_specs=pl.BlockSpec((tile, LANE), lambda i: (i, 0)),
        compiler_params=pltpu.CompilerParams(
            dimension_semantics=("parallel",)),
    )(s_p, l_p, w1s, w1l, w2, w21, w22, w23, w3, bias)

    return out[:B, :OUT_DIM].astype(jnp.float32)


def policy_forward(state, latent_code, params):
    """Original single-sample PyTorch signature: 1-D state / latent_code -> (20,)."""
    # Adaptive tiling gives this a single 16-row tile (not a 256+ row one).
    out = policy_forward_batched(state[None, :], latent_code[None, :], params)
    return out[0]


def reference_forward(states, latents, ws, bs, *, bf16_matmuls=False):
    """Pure-JAX reference.  bf16_matmuls=True mirrors the kernel's matmul precision."""
    x = jnp.concatenate([states, latents], axis=1).astype(jnp.float32)
    n = len(ws)
    for i, (w, b) in enumerate(zip(ws, bs)):
        if bf16_matmuls:
            y = jnp.dot(x.astype(jnp.bfloat16), w.astype(jnp.bfloat16),
                        preferred_element_type=jnp.float32)
        else:
            y = jnp.dot(x, w, preferred_element_type=jnp.float32)
        x = y + b
        if i < n - 1:
            x = jnp.maximum(x, 0.0)
    return jax.nn.softmax(x, axis=-1)


if __name__ == "__main__":
    state_dim, embedding_dim = 24, 8          # action_dim = OUT_DIM = 20
    batch = 60                                # -> 2 grid tiles of 32 rows (+4 pad rows)

    key = jax.random.PRNGKey(0)
    kp, ks, kl = jax.random.split(key, 3)
    (ws_f32, bs_f32), kparams = init_params(kp, state_dim, embedding_dim)
    states = jax.random.normal(ks, (batch, state_dim), jnp.float32)
    latents = jax.random.normal(kl, (batch, embedding_dim), jnp.float32)

    out = jax.block_until_ready(policy_forward_batched(states, latents, kparams))
    assert out.shape == (batch, OUT_DIM)

    ref_bf16 = reference_forward(states, latents, ws_f32, bs_f32, bf16_matmuls=True)
    ref_f32 = reference_forward(states, latents, ws_f32, bs_f32)

    assert jnp.allclose(jnp.sum(out, axis=-1), 1.0, atol=1e-2)     # bf16 output rounding
    assert jnp.allclose(out, ref_bf16, atol=5e-3, rtol=5e-3)       # same matmul precision
    assert jnp.allclose(out, ref_f32, atol=3e-2)                   # loose: bf16 weights

    # Original single-vector signature (matches PyTorch forward exactly).
    single = jax.block_until_ready(policy_forward(states[0], latents[0], kparams))
    assert single.shape == (OUT_DIM,)
    assert jnp.allclose(single, ref_bf16[0], atol=5e-3, rtol=5e-3)

    print("KERNEL_OK")
</pallas_src>

<mosaic_0001>
module attributes {stable_mosaic.version = 11 : i64} {
  func.func @policy_mlp_kernel(%arg0: i32, %arg1: memref<32x24xbf16, #tpu.memory_space<vmem>>, %arg2: memref<32x8xbf16, #tpu.memory_space<vmem>>, %arg3: memref<24x128xbf16, #tpu.memory_space<vmem>>, %arg4: memref<8x128xbf16, #tpu.memory_space<vmem>>, %arg5: memref<128x128xbf16, #tpu.memory_space<vmem>>, %arg6: memref<128x128xbf16, #tpu.memory_space<vmem>>, %arg7: memref<128x32xbf16, #tpu.memory_space<vmem>>, %arg8: memref<32x32xbf16, #tpu.memory_space<vmem>>, %arg9: memref<32x128xbf16, #tpu.memory_space<vmem>>, %arg10: memref<8x128xf32, #tpu.memory_space<vmem>>, %arg11: memref<32x128xbf16, #tpu.memory_space<vmem>>) attributes {dimension_semantics = [#tpu.dimension_semantics<parallel>], iteration_bounds = array<i64: 2>, scalar_prefetch = 0 : i64, scratch_operands = 0 : i64, tpu.core_type = #tpu.core_type<tc>, window_params = [{transform_indices = @transform_0, window_bounds = array<i64: 32, 24>}, {transform_indices = @transform_1, window_bounds = array<i64: 32, 8>}, {pipeline_mode = #tpu.pipeline_mode<synchronous>, transform_indices = @transform_2, window_bounds = array<i64: 24, 128>}, {pipeline_mode = #tpu.pipeline_mode<synchronous>, transform_indices = @transform_3, window_bounds = array<i64: 8, 128>}, {pipeline_mode = #tpu.pipeline_mode<synchronous>, transform_indices = @transform_4, window_bounds = array<i64: 128, 128>}, {pipeline_mode = #tpu.pipeline_mode<synchronous>, transform_indices = @transform_5, window_bounds = array<i64: 128, 128>}, {pipeline_mode = #tpu.pipeline_mode<synchronous>, transform_indices = @transform_6, window_bounds = array<i64: 128, 32>}, {pipeline_mode = #tpu.pipeline_mode<synchronous>, transform_indices = @transform_7, window_bounds = array<i64: 32, 32>}, {pipeline_mode = #tpu.pipeline_mode<synchronous>, transform_indices = @transform_8, window_bounds = array<i64: 32, 128>}, {pipeline_mode = #tpu.pipeline_mode<synchronous>, transform_indices = @transform_9, window_bounds = array<i64: 8, 128>}, {transform_indices = @transform_10, window_bounds = array<i64: 32, 128>}]} {
    %c0 = arith.constant 0 : index
    %c0_0 = arith.constant 0 : index
    %0 = vector.load %arg10[%c0, %c0_0] : memref<8x128xf32, #tpu.memory_space<vmem>>, vector<8x128xf32>
    %c0_1 = arith.constant 0 : index
    %c0_2 = arith.constant 0 : index
    %1 = vector.load %arg1[%c0_1, %c0_2] : memref<32x24xbf16, #tpu.memory_space<vmem>>, vector<32x24xbf16>
    %c0_3 = arith.constant 0 : index
    %c0_4 = arith.constant 0 : index
    %2 = vector.load %arg3[%c0_3, %c0_4] : memref<24x128xbf16, #tpu.memory_space<vmem>>, vector<24x128xbf16>
    %cst = arith.constant dense<0.000000e+00> : vector<32x128xf32>
    %3 = tpu.matmul %1, %2, %cst {dimension_numbers = #tpu.dot_dimension_numbers<[1], [0], [0], [1], [0, 0, 1, 1], [], []>} : vector<32x24xbf16>, vector<24x128xbf16>, vector<32x128xf32> -> vector<32x128xf32>
    %c0_5 = arith.constant 0 : index
    %c0_6 = arith.constant 0 : index
    %4 = vector.load %arg2[%c0_5, %c0_6] : memref<32x8xbf16, #tpu.memory_space<vmem>>, vector<32x8xbf16>
    %c0_7 = arith.constant 0 : index
    %c0_8 = arith.constant 0 : index
    %5 = vector.load %arg4[%c0_7, %c0_8] : memref<8x128xbf16, #tpu.memory_space<vmem>>, vector<8x128xbf16>
    %cst_9 = arith.constant dense<0.000000e+00> : vector<32x128xf32>
    %6 = tpu.matmul %4, %5, %cst_9 {dimension_numbers = #tpu.dot_dimension_numbers<[1], [0], [0], [1], [0, 0, 1, 1], [], []>} : vector<32x8xbf16>, vector<8x128xbf16>, vector<32x128xf32> -> vector<32x128xf32>
    %7 = arith.addf %3, %6 : vector<32x128xf32>
    %8 = vector.extract_strided_slice %0 {offsets = [0, 0], sizes = [1, 128], strides = [1, 1]} : vector<8x128xf32> to vector<1x128xf32>
    %9 = vector.broadcast %8 : vector<1x128xf32> to vector<32x128xf32>
    %10 = arith.addf %7, %9 : vector<32x128xf32>
    %cst_10 = arith.constant 0.000000e+00 : f32
    %11 = vector.broadcast %cst_10 : f32 to vector<32x128xf32>
    %12 = arith.maximumf %10, %11 : vector<32x128xf32>
    %13 = arith.truncf %12 : vector<32x128xf32> to vector<32x128xbf16>
    %c0_11 = arith.constant 0 : index
    %c0_12 = arith.constant 0 : index
    %14 = vector.load %arg5[%c0_11, %c0_12] : memref<128x128xbf16, #tpu.memory_space<vmem>>, vector<128x128xbf16>
    %cst_13 = arith.constant dense<0.000000e+00> : vector<32x128xf32>
    %15 = tpu.matmul %13, %14, %cst_13 {dimension_numbers = #tpu.dot_dimension_numbers<[1], [0], [0], [1], [0, 0, 1, 1], [], []>} : vector<32x128xbf16>, vector<128x128xbf16>, vector<32x128xf32> -> vector<32x128xf32>
    %16 = vector.extract_strided_slice %0 {offsets = [1, 0], sizes = [1, 128], strides = [1, 1]} : vector<8x128xf32> to vector<1x128xf32>
    %17 = vector.broadcast %16 : vector<1x128xf32> to vector<32x128xf32>
    %18 = arith.addf %15, %17 : vector<32x128xf32>
    %cst_14 = arith.constant 0.000000e+00 : f32
    %19 = vector.broadcast %cst_14 : f32 to vector<32x128xf32>
    %20 = arith.maximumf %18, %19 : vector<32x128xf32>
    %21 = arith.truncf %20 : vector<32x128xf32> to vector<32x128xbf16>
    %c0_15 = arith.constant 0 : index
    %c0_16 = arith.constant 0 : index
    %22 = vector.load %arg6[%c0_15, %c0_16] : memref<128x128xbf16, #tpu.memory_space<vmem>>, vector<128x128xbf16>
    %cst_17 = arith.constant dense<0.000000e+00> : vector<32x128xf32>
    %23 = tpu.matmul %21, %22, %cst_17 {dimension_numbers = #tpu.dot_dimension_numbers<[1], [0], [0], [1], [0, 0, 1, 1], [], []>} : vector<32x128xbf16>, vector<128x128xbf16>, vector<32x128xf32> -> vector<32x128xf32>
    %24 = vector.extract_strided_slice %0 {offsets = [2, 0], sizes = [1, 128], strides = [1, 1]} : vector<8x128xf32> to vector<1x128xf32>
    %25 = vector.broadcast %24 : vector<1x128xf32> to vector<32x128xf32>
    %26 = arith.addf %23, %25 : vector<32x128xf32>
    %cst_18 = arith.constant 0.000000e+00 : f32
    %27 = vector.broadcast %cst_18 : f32 to vector<32x128xf32>
    %28 = arith.maximumf %26, %27 : vector<32x128xf32>
    %29 = arith.truncf %28 : vector<32x128xf32> to vector<32x128xbf16>
    %c0_19 = arith.constant 0 : index
    %c0_20 = arith.constant 0 : index
    %30 = vector.load %arg7[%c0_19, %c0_20] : memref<128x32xbf16, #tpu.memory_space<vmem>>, vector<128x32xbf16>
    %cst_21 = arith.constant dense<0.000000e+00> : vector<32x32xf32>
    %31 = tpu.matmul %29, %30, %cst_21 {dimension_numbers = #tpu.dot_dimension_numbers<[1], [0], [0], [1], [0, 0, 1, 1], [], []>} : vector<32x128xbf16>, vector<128x32xbf16>, vector<32x32xf32> -> vector<32x32xf32>
    %32 = vector.extract_strided_slice %0 {offsets = [3, 0], sizes = [1, 32], strides = [1, 1]} : vector<8x128xf32> to vector<1x32xf32>
    %33 = vector.broadcast %32 : vector<1x32xf32> to vector<32x32xf32>
    %34 = arith.addf %31, %33 : vector<32x32xf32>
    %cst_22 = arith.constant 0.000000e+00 : f32
    %35 = vector.broadcast %cst_22 : f32 to vector<32x32xf32>
    %36 = arith.maximumf %34, %35 : vector<32x32xf32>
    %37 = arith.truncf %36 : vector<32x32xf32> to vector<32x32xbf16>
    %c0_23 = arith.constant 0 : index
    %c0_24 = arith.constant 0 : index
    %38 = vector.load %arg8[%c0_23, %c0_24] : memref<32x32xbf16, #tpu.memory_space<vmem>>, vector<32x32xbf16>
    %cst_25 = arith.constant dense<0.000000e+00> : vector<32x32xf32>
    %39 = tpu.matmul %37, %38, %cst_25 {dimension_numbers = #tpu.dot_dimension_numbers<[1], [0], [0], [1], [0, 0, 1, 1], [], []>} : vector<32x32xbf16>, vector<32x32xbf16>, vector<32x32xf32> -> vector<32x32xf32>
    %40 = vector.extract_strided_slice %0 {offsets = [4, 0], sizes = [1, 32], strides = [1, 1]} : vector<8x128xf32> to vector<1x32xf32>
    %41 = vector.broadcast %40 : vector<1x32xf32> to vector<32x32xf32>
    %42 = arith.addf %39, %41 : vector<32x32xf32>
    %cst_26 = arith.constant 0.000000e+00 : f32
    %43 = vector.broadcast %cst_26 : f32 to vector<32x32xf32>
    %44 = arith.maximumf %42, %43 : vector<32x32xf32>
    %45 = arith.truncf %44 : vector<32x32xf32> to vector<32x32xbf16>
    %c0_27 = arith.constant 0 : index
    %c0_28 = arith.constant 0 : index
    %46 = vector.load %arg9[%c0_27, %c0_28] : memref<32x128xbf16, #tpu.memory_space<vmem>>, vector<32x128xbf16>
    %cst_29 = arith.constant dense<0.000000e+00> : vector<32x128xf32>
    %47 = tpu.matmul %45, %46, %cst_29 {dimension_numbers = #tpu.dot_dimension_numbers<[1], [0], [0], [1], [0, 0, 1, 1], [], []>} : vector<32x32xbf16>, vector<32x128xbf16>, vector<32x128xf32> -> vector<32x128xf32>
    %48 = vector.extract_strided_slice %0 {offsets = [5, 0], sizes = [1, 128], strides = [1, 1]} : vector<8x128xf32> to vector<1x128xf32>
    %49 = vector.broadcast %48 : vector<1x128xf32> to vector<32x128xf32>
    %50 = arith.addf %47, %49 : vector<32x128xf32>
    %51 = tpu.iota {dimensions = array<i32: 1>} : vector<32x128xi32>
    %c20_i32 = arith.constant 20 : i32
    %52 = vector.broadcast %c20_i32 : i32 to vector<32x128xi32>
    %53 = arith.cmpi slt, %51, %52 : vector<32x128xi32>
    %cst_30 = arith.constant 0xFF800000 : f32
    %54 = vector.broadcast %cst_30 : f32 to vector<32x128xf32>
    %55 = arith.select %53, %50, %54 : vector<32x128xi1>, vector<32x128xf32>
    %cst_31 = arith.constant dense<0xFF800000> : vector<32xf32>
    %56 = vector.multi_reduction <maximumf>, %55, %cst_31 [1] : vector<32x128xf32> to vector<32xf32>
    %57 = vector.shape_cast %56 : vector<32xf32> to vector<32x1xf32>
    %58 = vector.broadcast %57 : vector<32x1xf32> to vector<32x128xf32>
    %59 = arith.subf %55, %58 : vector<32x128xf32>
    %60 = math.exp %59 : vector<32x128xf32>
    %cst_32 = arith.constant dense<0.000000e+00> : vector<32xf32>
    %61 = vector.multi_reduction <add>, %60, %cst_32 [1] : vector<32x128xf32> to vector<32xf32>
    %62 = vector.shape_cast %61 : vector<32xf32> to vector<32x1xf32>
    %63 = vector.broadcast %62 : vector<32x1xf32> to vector<32x128xf32>
    %64 = arith.divf %60, %63 : vector<32x128xf32>
    %65 = arith.truncf %64 : vector<32x128xf32> to vector<32x128xbf16>
    %c0_33 = arith.constant 0 : index
    %c0_34 = arith.constant 0 : index
    %66 = vector.load %arg11[%c0_33, %c0_34] : memref<32x128xbf16, #tpu.memory_space<vmem>>, vector<32x128xbf16>
    tpu.vector_store %arg11[%c0_33, %c0_34], %65 {strides = array<i32>} : memref<32x128xbf16, #tpu.memory_space<vmem>>, vector<32x128xbf16>,
    return
  }
  func.func @transform_0(%arg0: i32) -> (i32, i32) {
    %c0_i32 = arith.constant 0 : i32
    %c0_i32_0 = arith.constant 0 : i32
    return %arg0, %c0_i32 : i32, i32
  }
  func.func @transform_1(%arg0: i32) -> (i32, i32) {
    %c0_i32 = arith.constant 0 : i32
    %c0_i32_0 = arith.constant 0 : i32
    return %arg0, %c0_i32 : i32, i32
  }
  func.func @transform_2(%arg0: i32) -> (i32, i32) {
    %c0_i32 = arith.constant 0 : i32
    %c0_i32_0 = arith.constant 0 : i32
    %c0_i32_1 = arith.constant 0 : i32
    return %c0_i32, %c0_i32_0 : i32, i32
  }
  func.func @transform_3(%arg0: i32) -> (i32, i32) {
    %c0_i32 = arith.constant 0 : i32
    %c0_i32_0 = arith.constant 0 : i32
    %c0_i32_1 = arith.constant 0 : i32
    return %c0_i32, %c0_i32_0 : i32, i32
  }
  func.func @transform_4(%arg0: i32) -> (i32, i32) {
    %c0_i32 = arith.constant 0 : i32
    %c0_i32_0 = arith.constant 0 : i32
    %c0_i32_1 = arith.constant 0 : i32
    return %c0_i32, %c0_i32_0 : i32, i32
  }
  func.func @transform_5(%arg0: i32) -> (i32, i32) {
    %c0_i32 = arith.constant 0 : i32
    %c0_i32_0 = arith.constant 0 : i32
    %c0_i32_1 = arith.constant 0 : i32
    return %c0_i32, %c0_i32_0 : i32, i32
  }
  func.func @transform_6(%arg0: i32) -> (i32, i32) {
    %c0_i32 = arith.constant 0 : i32
    %c0_i32_0 = arith.constant 0 : i32
    %c0_i32_1 = arith.constant 0 : i32
    return %c0_i32, %c0_i32_0 : i32, i32
  }
  func.func @transform_7(%arg0: i32) -> (i32, i32) {
    %c0_i32 = arith.constant 0 : i32
    %c0_i32_0 = arith.constant 0 : i32
    %c0_i32_1 = arith.constant 0 : i32
    return %c0_i32, %c0_i32_0 : i32, i32
  }
  func.func @transform_8(%arg0: i32) -> (i32, i32) {
    %c0_i32 = arith.constant 0 : i32
    %c0_i32_0 = arith.constant 0 : i32
    %c0_i32_1 = arith.constant 0 : i32
    return %c0_i32, %c0_i32_0 : i32, i32
  }
  func.func @transform_9(%arg0: i32) -> (i32, i32) {
    %c0_i32 = arith.constant 0 : i32
    %c0_i32_0 = arith.constant 0 : i32
    %c0_i32_1 = arith.constant 0 : i32
    return %c0_i32, %c0_i32_0 : i32, i32
  }
  func.func @transform_10(%arg0: i32) -> (i32, i32) {
    %c0_i32 = arith.constant 0 : i32
    %c0_i32_0 = arith.constant 0 : i32
    return %arg0, %c0_i32 : i32, i32
  }
}

</mosaic_0001>

<bundles_post_ra>
// kernel: tpu_custom_call.1
= control target key start
LH: loop header
LB: loop body
LE: loop exit
PB: predicated region body
PF: predicated region fallthrough
CT: control target
= control target key end

     0   :  { %15 = vsyncpa [#allocation3], 0  ;;  %s1710_s0 = inlined_call_operand.vmem [shape: bf16[64,24], index: 0, kind: input, shape index: {}]   ;;  %s1711_s1 = inlined_call_operand.vmem [shape: bf16[64,8], index: 1, kind: input, shape index: {}]   ;;  %s1712_s2 = inlined_call_operand.vmem [shape: bf16[24,128], index: 2, kind: input, shape index: {}]   ;;  %s1713_s3 = inlined_call_operand.vmem [shape: bf16[8,128], index: 3, kind: input, shape index: {}]   ;;  %s1714_s4 = inlined_call_operand.vmem [shape: bf16[128,128], index: 4, kind: input, shape index: {}]   ;;  %s1715_s5 = inlined_call_operand.hbm [shape: bf16[128,128], index: 5, kind: input, shape index: {}]   ;;  %s1716_s6 = inlined_call_operand.vmem [shape: bf16[128,32], index: 6, kind: input, shape index: {}]   ;;  %s1717_s7 = inlined_call_operand.vmem [shape: bf16[32,32], index: 7, kind: input, shape index: {}]   ;;  %s1718_s8 = inlined_call_operand.vmem [shape: bf16[32,128], index: 8, kind: input, shape index: {}]   ;;  %s1719_s9 = inlined_call_operand.vmem [shape: f32[8,128], index: 9, kind: input, shape index: {}]   ;;  %s1720_s10 = inlined_call_operand.hbm [shape: bf16[64,128], index: 10, kind: output, shape index: {}]  }
   0x1   :  { %16 = vsyncpa [#allocation4], 0 }
   0x2   :  { %18 = vsyncpa [#allocation4 + $0x1], 0  ;;  %s1510_s13 = smov 0   ;;  %s1512_s14 = smov 0  }
   0x3   :  { %s1514_s15 = smov 0   ;;  %s1516_s16 = smov 0  }
   0x4 LB: > { %s1531_s17 = sadd.s32 4294967295, %s1448_s16   ;;  %s1079_s18 = sadd.s32 4294967294, %s1448_s16   ;;  %s1448_s16 = sphi %s1516_s16, %s1726_s16   ;;  %s1444_s15 = sphi %s1514_s15, %s1725_s15   ;;  %s1440_s14 = sphi %s1512_s14, %s1724_s14   ;;  %s1436_s13 = sphi %s1510_s13, %s1723_s13  }
   0x5   : > { %s1535_s19 = sadd.s32 1, %s1448_s16   ;;  %s251_s20 = sadd.s32 1, %s1444_s15 }
   0x6   : > { %s248_s21 = ssub.s32 %s1448_s16, %s1535_s19  ;;  %p261_p0 = scmp.ne.s32.totalorder %s1444_s15, %s1440_s14 }
   0x7   : > { %p249_p1 = scmp.eq.s32.totalorder %s248_s21, 0  ;;  %p262_p2 = scmp.eq.s32.totalorder %s1531_s17, 1 }
   0x8   : > { %p267_p3 = scmp.ne.s32.totalorder %s1440_s14, %s1436_s13  ;;  %p268_p4 = scmp.eq.s32.totalorder %s1079_s18, 1 }
   0x9   : > { %s1546_s22 = scalar_select %p249_p1, %s1444_s15, %s251_s20  }
   0xa   : > { %p1548_p5 = por %p262_p2, %p261_p0  ;;  %p1552_p6 = por %p268_p4, %p267_p3 }
   0xb   : > { %p1080_p7 = scmp.ge.s32.totalorder %s1448_s16, 1  ;;  %p275_p8 = scmp.lt.s32.totalorder %s1448_s16, 3 }
   0xc   : > { %p1296_p9 = scmp.eq.s32.totalorder %s1531_s17, 0  ;;  %s295_s27 = sshll.u32 %s1715_s5, 4  ;;  %s296_s27 = int_to_ptr.hbm [resolvable:$true] %s295_s27 }
   0xd   : > { %p276_p10 = pnand %p1080_p7, %p275_p8  ;;  %s1450_s28 = smov [#allocation2]  }
   0xe   : > { %s297_s29 = sshll.u32 %s1450_s28, 4  ;;  %s1451_s30 = smov 64   ;;  %s298_s29 = int_to_ptr.vmem [resolvable:$true] %s297_s29 }
   0xf   : > { %p1288_p11 = pneg %p276_p10  ;;  %s1452_s11 = smov 4  }
  0x10   : > { %343 = sbr.rel (%p276_p10) target bundleno = 1177 (0x499), region = 60 }
  0x11   : > { %p1289_p12 = pnand %p1296_p9, %p1288_p11 }
  0x13   : > { %1291 = dma.hbm_to_vmem [thread:$0]  (!%p1289_p12), %s296_s27, 1024, %s298_s29, [#allocation3], %s1451_s30, %s1451_s30, %s1452_s11  }
  0x15   : > { %1427 = dma.done.wait (%p1296_p9), [#allocation3], 1024  }
  0x16   : > { %1429 = vsyncadd (%p1296_p9), [#allocation3], 4294966272  ;;  %s1086_s12 = sshll.u32 %s1531_s17, 2  ;;  %vm431_vm0 = vcmask 1043456   ;;  %v413_v0 = vld [vmem:[%s1713_s3] sm:$0xf] }
  0x17   : > { %p388_p13 = scmp.lt.s32.totalorder %s1086_s12, 7  ;;  %v408_v1 = vld [vmem:[%s1712_s2 + $0x8] sm:$0xf]  ;;  %v433_v2 = vsel %vm431_vm0, %v413_v0, 0  ;;  %vm424_vm1 = vcmask 64512   ;;  %v1247_v5 = vld [vmem:[%s1714_s4 + $0x38] sm:$0xff] }
  0x18   : > { %v469_v4 = vunpack.c.l.b16 %v408_v1  ;;  %442 = vmatpush.bf16.msra.mxu0 %v433_v2  ;;  %578 = vmatpush.bf16.msra.mxu2 %v1247_v5  ;;  %v1246_v7 = vld [vmem:[%s1714_s4 + $0x30] sm:$0xff]  ;;  %v1237_v9 = vld [vmem:[%s1712_s2] sm:$0xff]  ;;  %vm473_vm2 = vcmask 195584   ;;  %v1245_v13 = vld [vmem:[%s1714_s4 + $0x28] sm:$0xff]  ;;  %vm800_vm3 = vcmask 261120   ;;  %s384_s21 = sand.u32 1, %s1440_s14  }
  0x19   : > { %s1728_s12 = smov (!%p388_p13, %s1086_s12), 7  ;;  %v1244_v14 = vld [vmem:[%s1714_s4 + $0x20] sm:$0xff]  ;;  %v1243_v15 = vld [vmem:[%s1714_s4 + $0x18] sm:$0xff]  ;;  %v1242_v16 = vld [vmem:[%s1714_s4 + $0x10] sm:$0xff]  ;;  %s1268_s28 = sshll.u32 %s1531_s17, 4 }
  0x1a   : > { %s1087_s18 = sshll.u32 %s1728_s12, 2  ;;  %v471_v6 = vpack.c.b16 %v469_v4, %v469_v4  ;;  %v1241_v17 = vld [vmem:[%s1714_s4 + $0x8] sm:$0xff]  ;;  %v1240_v18 = vld [vmem:[%s1714_s4] sm:$0xff]  ;;  %v1255_v21 = vld [vmem:[#allocation2 + $0x38] sm:$0xff]  ;;  %s989_s30 = scalar_lea.hbm %s1720_s10, %s1268_s28 }
  0x1b   : > { %s397_s25 = scalar_lea.vmem %s1711_s1, %s1087_s18  ;;  %s391_s29 = scalar_lea.vmem %s1710_s0, %s1087_s18  ;;  %v1613_v22 = vld [vmem:[%s1719_s9] sm:$0xff]  ;;  %668 = vmatpush.bf16.msra.mxu3 %v1255_v21  ;;  %v1254_v23 = vld [vmem:[#allocation2 + $0x30] sm:$0xff]  ;;  %v1253_v27 = vld [vmem:[#allocation2 + $0x28] sm:$0xff] }
  0x1c   : > { %v1238_v3 = vld [vmem:[%s397_s25] sm:$0xff]  ;;  %v481_v8 = vsel %vm431_vm0, %v471_v6, 0  ;;  %579 = vmatpush.bf16.msra.mxu2 %v1246_v7  ;;  %v1239_v11 = vld [vmem:[%s397_s25 + $0x8] sm:$0xff]  ;;  %v502_v26 = vperm.slane %v1613_v22, 0  ;;  %v1251_v47 = vld [vmem:[#allocation2 + $0x18] sm:$0xff]  ;;  %v529_v54 = vperm.slane %v1613_v22, 1 }
  0x1d   : > { %1098 = vmatmul.msk.bf16.vlgmr.msra.gmra.mxu0 %vm424_vm1, %v1238_v3  ;;  %489 = vmatpush.bf16.msra.mxu1 %v481_v8  ;;  %v1235_v10 = vld [vmem:[%s391_s29] sm:$0xff]  ;;  %v1236_v12 = vld [vmem:[%s391_s29 + $0x8] sm:$0xff]  ;;  %v1250_v48 = vld [vmem:[#allocation2 + $0x10] sm:$0xff]  ;;  %s1085_s25 = sshll.u32 %s384_s21, 4  ;;  %s992_s11 = sshll.u32 %s989_s30, 4  ;;  %s993_s11 = int_to_ptr.hbm [resolvable:$true] %s992_s11 }
  0x1e   : > { %v1252_v32 = vld [vmem:[#allocation2 + $0x20] sm:$0xff]  ;;  %v1249_v49 = vld [vmem:[#allocation2 + $0x8] sm:$0xff]  ;;  %v1263_v51 = vld [vmem:[%s1716_s6 + $0x38] sm:$0xff]  ;;  %s1670_s26 = scalar_lea.vmem [#allocation5], %s1085_s25  ;;  %s978_s12 = scalar_lea.sflag [#allocation4], %s384_s21 }
  0x1f   : > { %669 = vmatpush.bf16.msra.mxu3 %v1254_v23  ;;  %v1248_v50 = vld [vmem:[#allocation2] sm:$0xff]  ;;  %758 = vmatpush.bf16.msrb.mxu0 %v1263_v51  ;;  %v1262_v53 = vld [vmem:[%s1716_s6 + $0x30] sm:$0xff]  ;;  %v1261_v55 = vld [vmem:[%s1716_s6 + $0x28] sm:$0xff]  ;;  %s990_s17 = sshll.u32 %s1670_s26, 4  ;;  %s1396_s20 = sshra.s32 %s993_s11, 4  ;;  %s991_s17 = int_to_ptr.vmem [resolvable:$true] %s990_s17  ;;  %s1397_s20 = int_to_ptr.hbm [resolvable:$true] %s1396_s20 }
  0x20   : > { %580 = vmatpush.bf16.msra.mxu2 %v1245_v13  ;;  %v1260_v59 = vld [vmem:[%s1716_s6 + $0x20] sm:$0xff]  ;;  %v1259_v63 = vld [vmem:[%s1716_s6 + $0x18] sm:$0xff]  ;;  %v1258_v7 = vld [vmem:[%s1716_s6 + $0x10] sm:$0xff]  ;;  %v619_v13 = vperm.slane %v1613_v22, 2  ;;  %s1398_s18 = scalar_lea.hbm %s1397_s20, 16  ;;  %s1402_s27 = scalar_lea.hbm %s1720_s10, 32 }
  0x21   : > { %490 = vmatpush.bf16.msra.mxu1 %v1237_v9  ;;  %v1257_v8 = vld [vmem:[%s1716_s6 + $0x8] sm:$0xff]  ;;  %v1256_v9 = vld [vmem:[%s1716_s6] sm:$0xff]  ;;  %p1399_p0 = scmp.ne.s32.totalorder %s1397_s20, %s1398_s18  ;;  %p1403_p3 = scmp.lt.s32.totalorder %s1397_s20, %s1720_s10 }
  0x22   : > { %p1404_p4 = scmp.lt.s32.totalorder %s1402_s27, %s1398_s18 }
  0x23   : > { %670 = vmatpush.bf16.msra.mxu3 %v1253_v27  ;;  %759 = vmatpush.bf16.msrb.mxu0 %v1262_v53  ;;  %p1400_p1 = pnand %p1399_p0, %p1548_p5 }
  0x24   : > { %1112 = vmatmul.msk.bf16.vlgmr.msra.gmra.mxu1 %vm473_vm2, %v1235_v10  ;;  %581 = vmatpush.bf16.msra.mxu2 %v1244_v14  ;;  %v1265_v10 = vld [vmem:[%s1717_s7 + $0x8] sm:$0xff]  ;;  %p1405_p7 = por %p1404_p4, %p1403_p3 }
  0x25   : > { %813 = vmatpush.bf16.msrb.mxu1 %v1265_v10  ;;  %p1401_p2 = pneg %p1400_p1 }
  0x27   : > { %671 = vmatpush.bf16.msra.mxu3 %v1252_v32  ;;  %760 = vmatpush.bf16.msrb.mxu0 %v1261_v55  ;;  %p1406_p8 = pnand %p1405_p7, %p1401_p2 }
  0x28   : > { %582 = vmatpush.bf16.msra.mxu2 %v1243_v15 }
  0x2b   : > { %672 = vmatpush.bf16.msra.mxu3 %v1251_v47  ;;  %761 = vmatpush.bf16.msrb.mxu0 %v1260_v59 }
  0x2c   : > { %583 = vmatpush.bf16.msra.mxu2 %v1242_v16 }
  0x2d   : > { %1099 = vmatmul.msk.bf16.gmra.mxu0 %vm424_vm1, %v1239_v11 }
  0x2f   : > { %673 = vmatpush.bf16.msra.mxu3 %v1250_v48  ;;  %762 = vmatpush.bf16.msrb.mxu0 %v1259_v63 }
  0x30   : > { %584 = vmatpush.bf16.msra.mxu2 %v1241_v17 }
  0x33   : > { %674 = vmatpush.bf16.msra.mxu3 %v1249_v49  ;;  %763 = vmatpush.bf16.msrb.mxu0 %v1258_v7 }
  0x34   : > { %1113 = vmatmul.msk.bf16.gmra.mxu1 %vm473_vm2, %v1236_v12  ;;  %585 = vmatpush.bf16.msra.mxu2 %v1240_v18  ;;  %v1264_v12 = vld [vmem:[%s1717_s7] sm:$0xff] }
  0x35   : > { %814 = vmatpush.bf16.msrb.mxu1 %v1264_v12 }
  0x37   : > { %675 = vmatpush.bf16.msra.mxu3 %v1248_v50  ;;  %764 = vmatpush.bf16.msrb.mxu0 %v1257_v8 }
  0x3b   : > { %765 = vmatpush.bf16.msrb.mxu0 %v1256_v9 }
  0x9a   : > { %v444_v19 = vpop.f32.mrf.mxu0 }
  0xa1   : > { %v492_v20 = vpop.f32.mrf.mxu1 }
  0xa2   : > { %v446_v24 = vpop.f32.mrf.mxu0  ;;  %v493_v25 = vadd.f32 %v492_v20, %v444_v19 }
  0xa4   : > { %v503_v29 = vadd.f32 %v502_v26, %v493_v25 }
  0xa6   : > { %v507_v33 = vmax.f32 %v503_v29, 0.0 }
  0xa9   : > { %v494_v28 = vpop.f32.mrf.mxu1 }
  0xaa   : > { %v495_v30 = vadd.f32 %v494_v28, %v446_v24  ;;  %v449_v35 = vpop.f32.mrf.mxu0  ;;  %v1267_v28 = vld [vmem:[%s1718_s8 + $0x8] sm:$0xff] }
  0xab   : > { %861 = vmatpush.bf16.msrb.mxu2 %v1267_v28  ;;  %1280 = vmatpush.bf16.msrb.mxu3 %v1267_v28 }
  0xac   : > { %v504_v31 = vadd.f32 %v502_v26, %v495_v30  ;;  %v709_v30 = vperm.slane %v1613_v22, 3 }
  0xae   : > { %v508_v34 = vmax.f32 %v504_v31, 0.0 }
  0xb0   : > { %v511_v36 = vpack.c.bf16 %v508_v34, %v507_v33 }
  0xb1   : > { %v497_v37 = vpop.f32.mrf.mxu1 }
  0xb2   : > { %586 = vmatmul.bf16.vlgmr.msra.gmra.mxu2 %v511_v36  ;;  %v498_v38 = vadd.f32 %v497_v37, %v449_v35  ;;  %v451_v39 = vpop.f32.mrf.mxu0 }
  0xb4   : > { %v505_v41 = vadd.f32 %v502_v26, %v498_v38 }
  0xb6   : > { %v509_v44 = vmax.f32 %v505_v41, 0.0 }
  0xb9   : > { %v499_v40 = vpop.f32.mrf.mxu1 }
  0xba   : > { %v500_v42 = vadd.f32 %v499_v40, %v451_v39 }
  0xbc   : > { %v506_v43 = vadd.f32 %v502_v26, %v500_v42 }
  0xbe   : > { %v510_v45 = vmax.f32 %v506_v43, 0.0 }
  0xc0   : > { %v512_v46 = vpack.c.bf16 %v510_v45, %v509_v44  ;;  %v1266_v44 = vld [vmem:[%s1718_s8] sm:$0xff] }
  0xc1   : > { %862 = vmatpush.bf16.msrb.mxu2 %v1266_v44  ;;  %1281 = vmatpush.bf16.msrb.mxu3 %v1266_v44 }
  0xc2   : > { %591 = vmatmul.bf16.gmra.mxu2 %v512_v46  ;;  %v787_v46 = vperm.slane %v1613_v22, 4 }
 0x135   : > { %v587_v52 = vpop.f32.mrf.mxu2 }
 0x136   : > { %v588_v56 = vadd.f32 %v587_v52, %v529_v54 }
 0x138   : > { %v597_v60 = vmax.f32 %v588_v56, 0.0 }
 0x13d   : > { %v589_v57 = vpop.f32.mrf.mxu2 }
 0x13e   : > { %v590_v58 = vadd.f32 %v589_v57, %v529_v54 }
 0x140   : > { %v598_v61 = vmax.f32 %v590_v58, 0.0 }
 0x142   : > { %v601_v62 = vpack.c.bf16 %v598_v61, %v597_v60  ;;  %v874_v60 = vlaneseq }
 0x144   : > { %676 = vmatmul.bf16.vlgmr.msra.gmra.mxu3 %v601_v62  ;;  %v875_v61 = vand.u32 127, %v874_v60  ;;  %v836_v62 = vperm.slane %v1613_v22, 5 }
 0x145   : > { %v592_v0 = vpop.f32.mrf.mxu2 }
 0x146   : > { %v593_v1 = vadd.f32 %v592_v0, %v529_v54  ;;  %vm876_vm4 = vcmp.lt.s32.totalorder %v875_v61, 20 }
 0x148   : > { %v599_v4 = vmax.f32 %v593_v1, 0.0 }
 0x14d   : > { %v594_v2 = vpop.f32.mrf.mxu2 }
 0x14e   : > { %v595_v3 = vadd.f32 %v594_v2, %v529_v54 }
 0x150   : > { %v600_v5 = vmax.f32 %v595_v3, 0.0 }
 0x152   : > { %v602_v6 = vpack.c.bf16 %v600_v5, %v599_v4 }
 0x154   : > { %681 = vmatmul.bf16.gmra.mxu3 %v602_v6 }
 0x1c7   : > { %v677_v11 = vpop.f32.mrf.mxu3 }
 0x1c8   : > { %v678_v14 = vadd.f32 %v677_v11, %v619_v13 }
 0x1ca   : > { %v687_v17 = vmax.f32 %v678_v14, 0.0 }
 0x1cf   : > { %v679_v15 = vpop.f32.mrf.mxu3 }
 0x1d0   : > { %v680_v16 = vadd.f32 %v679_v15, %v619_v13 }
 0x1d2   : > { %v688_v18 = vmax.f32 %v680_v16, 0.0 }
 0x1d4   : > { %v691_v19 = vpack.c.bf16 %v688_v18, %v687_v17 }
 0x1d6   : > { %766 = vmatmul.bf16.vlgmr.msrb.gmra.mxu0 %v691_v19 }
 0x1d7   : > { %v682_v20 = vpop.f32.mrf.mxu3 }
 0x1d8   : > { %v683_v21 = vadd.f32 %v682_v20, %v619_v13 }
 0x1da   : > { %v689_v25 = vmax.f32 %v683_v21, 0.0 }
 0x1df   : > { %v684_v23 = vpop.f32.mrf.mxu3 }
 0x1e0   : > { %v685_v24 = vadd.f32 %v684_v23, %v619_v13 }
 0x1e2   : > { %v690_v26 = vmax.f32 %v685_v24, 0.0 }
 0x1e4   : > { %v692_v27 = vpack.c.bf16 %v690_v26, %v689_v25 }
 0x1e6   : > { %771 = vmatmul.bf16.gmra.mxu0 %v692_v27 }
 0x253   : > { %v767_v29 = vpop.f32.mrf.mxu0 }
 0x254   : > { %v768_v31 = vadd.f32 %v767_v29, %v709_v30 }
 0x256   : > { %v777_v34 = vmax.f32 %v768_v31, 0.0 }
 0x25b   : > { %v769_v32 = vpop.f32.mrf.mxu0 }
 0x25c   : > { %v770_v33 = vadd.f32 %v769_v32, %v709_v30 }
 0x25e   : > { %v778_v35 = vmax.f32 %v770_v33, 0.0 }
 0x260   : > { %v781_v36 = vpack.c.bf16 %v778_v35, %v777_v34 }
 0x262   : > { %1218 = vmatmul.msk.bf16.vlgmr.msrb.gmra.mxu1 %vm800_vm3, %v781_v36 }
 0x263   : > { %v772_v37 = vpop.f32.mrf.mxu0 }
 0x264   : > { %v773_v38 = vadd.f32 %v772_v37, %v709_v30 }
 0x266   : > { %v779_v41 = vmax.f32 %v773_v38, 0.0 }
 0x26b   : > { %v774_v39 = vpop.f32.mrf.mxu0 }
 0x26c   : > { %v775_v40 = vadd.f32 %v774_v39, %v709_v30 }
 0x26e   : > { %v780_v42 = vmax.f32 %v775_v40, 0.0 }
 0x270   : > { %v782_v43 = vpack.c.bf16 %v780_v42, %v779_v41 }
 0x272   : > { %1219 = vmatmul.msk.bf16.gmra.mxu1 %vm800_vm3, %v782_v43 }
 0x2df   : > { %v816_v45 = vpop.f32.mrf.mxu1 }
 0x2e0   : > { %v817_v47 = vadd.f32 %v816_v45, %v787_v46 }
 0x2e2   : > { %v826_v50 = vmax.f32 %v817_v47, 0.0 }
 0x2e7   : > { %v818_v48 = vpop.f32.mrf.mxu1 }
 0x2e8   : > { %v819_v49 = vadd.f32 %v818_v48, %v787_v46 }
 0x2ea   : > { %v827_v51 = vmax.f32 %v819_v49, 0.0 }
 0x2ec   : > { %v830_v52 = vpack.c.bf16 %v827_v51, %v826_v50 }
 0x2ee   : > { %1228 = vmatmul.msk.bf16.vlgmr.msrb.gmra.mxu2 %vm800_vm3, %v830_v52 }
 0x2ef   : > { %v821_v53 = vpop.f32.mrf.mxu1 }
 0x2f0   : > { %v822_v54 = vadd.f32 %v821_v53, %v787_v46 }
 0x2f2   : > { %v828_v57 = vmax.f32 %v822_v54, 0.0 }
 0x2f7   : > { %v823_v55 = vpop.f32.mrf.mxu1 }
 0x2f8   : > { %v824_v56 = vadd.f32 %v823_v55, %v787_v46 }
 0x2fa   : > { %v829_v58 = vmax.f32 %v824_v56, 0.0 }
 0x2fc   : > { %v831_v59 = vpack.c.bf16 %v829_v58, %v828_v57 }
 0x2fe   : > { %1229 = vmatmul.msk.bf16.vlgmr.msrb.gmra.mxu3 %vm800_vm3, %v831_v59 }
 0x371   : > { %v864_v63 = vpop.f32.mrf.mxu2 }
 0x372   : > { %v865_v0 = vadd.f32 %v864_v63, %v836_v62 }
 0x374   : > { %v877_v1 = vsel %vm876_vm4, %v865_v0, -inf }
 0x375   : > { %881 = vmax.xlane.f32.xlu0 %v877_v1 }
 0x379   : > { %v866_v2 = vpop.f32.mrf.mxu2 }
 0x37a   : > { %v867_v3 = vadd.f32 %v866_v2, %v836_v62 }
 0x37c   : > { %v878_v4 = vsel %vm876_vm4, %v867_v3, -inf }
 0x37d   : > { %883 = vmax.xlane.f32.xlu0 %v878_v4 }
 0x381   : > { %v869_v5 = vpop.f32.mrf.mxu3 }
 0x382   : > { %v870_v6 = vadd.f32 %v869_v5, %v836_v62 }
 0x384   : > { %v879_v7 = vsel %vm876_vm4, %v870_v6, -inf }
 0x385   : > { %885 = vmax.xlane.f32.xlu1 %v879_v7 }
 0x389   : > { %v871_v8 = vpop.f32.mrf.mxu3 }
 0x38a   : > { %v872_v9 = vadd.f32 %v871_v8, %v836_v62 }
 0x38c   : > { %v880_v10 = vsel %vm876_vm4, %v872_v9, -inf }
 0x38d   : > { %887 = vmax.xlane.f32.xlu1 %v880_v10 }
 0x3e8   : > { %v882_v11 = vpop.xlane.xlu0 %881 }
 0x3e9   : > { %v889_v12 = vsub.f32 %v877_v1, %v882_v11 }
 0x3eb   : > { %v893_v22 = vmul.f32 1.442695, %v889_v12 }
 0x3ed   : > { %1336 = vpow2.f32 %v893_v22 }
 0x3f0   : > { %v884_v13 = vpop.xlane.xlu0 %883 }
 0x3f1   : > { %v890_v14 = vsub.f32 %v878_v4, %v884_v13 }
 0x3f3   : > { %v1337_v15 = vpop.eup %1336  ;;  %v895_v16 = vmul.f32 1.442695, %v890_v14 }
 0x3f4   : > { %901 = vadd.xlane.f32.xlu2 %v1337_v15 }
 0x3f5   : > { %1338 = vpow2.f32 %v895_v16 }
 0x3f8   : > { %v886_v17 = vpop.xlane.xlu1 %885 }
 0x3f9   : > { %v891_v18 = vsub.f32 %v879_v7, %v886_v17 }
 0x3fb   : > { %v1339_v19 = vpop.eup %1338  ;;  %v897_v20 = vmul.f32 1.442695, %v891_v18 }
 0x3fc   : > { %903 = vadd.xlane.f32.xlu2 %v1339_v19 }
 0x3fd   : > { %1340 = vpow2.f32 %v897_v20 }
 0x400   : > { %v888_v21 = vpop.xlane.xlu1 %887 }
 0x401   : > { %v892_v23 = vsub.f32 %v880_v10, %v888_v21 }
 0x403   : > { %v1661_v24 = vpop.eup %1340  ;;  %v899_v25 = vmul.f32 1.442695, %v892_v23 }
 0x404   : > { %905 = vadd.xlane.f32.xlu0 %v1661_v24 }
 0x405   : > { %1342 = vpow2.f32 %v899_v25 }
 0x40b   : > { %v1664_v26 = vpop.eup %1342 }
 0x40c   : > { %907 = vadd.xlane.f32.xlu1 %v1664_v26 }
 0x467   : > { %v902_v27 = vpop.xlane.xlu2 %901 }
 0x468   : > { %1344 = vrcp.f32 %v902_v27  ;;  %v920_v37 = vand.u32 2147483648, %v902_v27  ;;  %vm914_vm6 = vweird.f32 %v902_v27  ;;  %v918_v38 = vand.u32 2147483647, %v902_v27 }
 0x46a   : > { %v921_v44 = vor.u32 1.1754944e-38, %v920_v37  ;;  %vm919_vm9 = vcmp.eq.f32.partialorder %v918_v38, 8.507059e+37 }
 0x46e   : > { %v1345_v28 = vpop.eup %1344 }
 0x46f   : > { %v910_v29 = vmul.f32 %v1345_v28, %v902_v27  ;;  %v904_v30 = vpop.xlane.xlu2 %903  ;;  %vm915_vm5 = vweird.f32 %v1345_v28 }
 0x470   : > { %1346 = vrcp.f32 %v904_v30  ;;  %vm916_vm7 = vmor %vm914_vm6, %vm915_vm5  ;;  %v935_v40 = vand.u32 2147483648, %v904_v30  ;;  %v933_v43 = vand.u32 2147483647, %v904_v30  ;;  %vm929_vm10 = vweird.f32 %v904_v30 }
 0x471   : > { %v911_v31 = vsub.f32 1.0, %v910_v29 }
 0x472   : > { %v936_v48 = vor.u32 1.1754944e-38, %v935_v40  ;;  %vm934_vm12 = vcmp.eq.f32.partialorder %v933_v43, 8.507059e+37 }
 0x473   : > { %v912_v32 = vmul.f32 %v1345_v28, %v911_v31 }
 0x475   : > { %v913_v34 = vadd.f32 %v1345_v28, %v912_v32 }
 0x476   : > { %v1347_v33 = vpop.eup %1346 }
 0x477   : > { %v925_v35 = vmul.f32 %v1347_v33, %v904_v30  ;;  %v906_v36 = vpop.xlane.xlu0 %905  ;;  %v917_v41 = vsel %vm916_vm7, %v1345_v28, %v913_v34  ;;  %vm930_vm8 = vweird.f32 %v1347_v33 }
 0x478   : > { %1348 = vrcp.f32 %v906_v36  ;;  %v922_v47 = vsel %vm919_vm9, %v921_v44, %v917_v41  ;;  %vm931_vm11 = vmor %vm929_vm10, %vm930_vm8  ;;  %v950_v61 = vand.u32 2147483648, %v906_v36  ;;  %vm944_vm14 = vweird.f32 %v906_v36 }
 0x479   : > { %v926_v39 = vsub.f32 1.0, %v925_v35  ;;  %v923_v53 = vmul.f32 %v1337_v15, %v922_v47  ;;  %v948_v62 = vand.u32 2147483647, %v906_v36 }
 0x47a   : > { %v951_v4 = vor.u32 1.1754944e-38, %v950_v61 }
 0x47b   : > { %v927_v42 = vmul.f32 %v1347_v33, %v926_v39  ;;  %vm949_vm1 = vcmp.eq.f32.partialorder %v948_v62, 8.507059e+37 }
 0x47d   : > { %v928_v45 = vadd.f32 %v1347_v33, %v927_v42 }
 0x47e   : > { %v1349_v46 = vpop.eup %1348 }
 0x47f   : > { %v932_v49 = vsel %vm931_vm11, %v1347_v33, %v928_v45  ;;  %v940_v50 = vmul.f32 %v1349_v46, %v906_v36  ;;  %v908_v51 = vpop.xlane.xlu1 %907  ;;  %vm945_vm13 = vweird.f32 %v1349_v46 }
 0x480   : > { %v937_v52 = vsel %vm934_vm12, %v936_v48, %v932_v49  ;;  %1350 = vrcp.f32 %v908_v51  ;;  %vm946_vm15 = vmor %vm944_vm14, %vm945_vm13  ;;  %v965_v0 = vand.u32 2147483648, %v908_v51  ;;  %v963_v3 = vand.u32 2147483647, %v908_v51 }
 0x481   : > { %v938_v54 = vmul.f32 %v1339_v19, %v937_v52  ;;  %v941_v55 = vsub.f32 1.0, %v940_v50  ;;  %vm959_vm2 = vweird.f32 %v908_v51 }
 0x482   : > { %v966_v7 = vor.u32 1.1754944e-38, %v965_v0  ;;  %vm964_vm4 = vcmp.eq.f32.partialorder %v963_v3, 8.507059e+37 }
 0x483   : > { %v1272_v56 = vpack.c.bf16 %v938_v54, %v923_v53  ;;  %v942_v57 = vmul.f32 %v1349_v46, %v941_v55 }
 0x485   : > { %1273 = vst [vmem:[%s1670_s26] sm:$0xff] %v1272_v56   ;;  %v943_v59 = vadd.f32 %v1349_v46, %v942_v57 }
 0x486   : > { %v1351_v58 = vpop.eup %1350 }
 0x487   : > { %v955_v60 = vmul.f32 %v1351_v58, %v908_v51  ;;  %v947_v1 = vsel %vm946_vm15, %v1349_v46, %v943_v59  ;;  %vm960_vm0 = vweird.f32 %v1351_v58 }
 0x488   : > { %v952_v6 = vsel %vm949_vm1, %v951_v4, %v947_v1  ;;  %vm961_vm3 = vmor %vm959_vm2, %vm960_vm0 }
 0x489   : > { %v956_v63 = vsub.f32 1.0, %v955_v60  ;;  %v953_v10 = vmul.f32 %v1661_v24, %v952_v6 }
 0x48b   : > { %v957_v2 = vmul.f32 %v1351_v58, %v956_v63 }
 0x48d   : > { %v958_v5 = vadd.f32 %v1351_v58, %v957_v2 }
 0x48f   : > { %v962_v8 = vsel %vm961_vm3, %v1351_v58, %v958_v5 }
 0x490   : > { %v967_v9 = vsel %vm964_vm4, %v966_v7, %v962_v8 }
 0x491   : > { %v968_v11 = vmul.f32 %v1664_v26, %v967_v9 }
 0x493   : > { %v1277_v12 = vpack.c.bf16 %v968_v11, %v953_v10 }
 0x495   : > { %1279 = vst [vmem:[%s1670_s26 + $0x8] sm:$0xff] %v1277_v12  }
 0x496   : > { %1409 = shalt.err (!%p1406_p8)
}
 0x497   : > { %s1453_s21 = smov 64   ;;  %s1454_s26 = smov 4  }
 0x498   : > { %1286 = dma.vmem_to_hbm [thread:$0]  (%p1548_p5), %s991_s17, 256, %s993_s11, %s978_s12, %s1453_s21, %s1453_s21, %s1454_s26  }
 0x499 PF: > { %p1298_p9 = scmp.ge.s32.totalorder %s1448_s16, 2  ;;  %s1007_s25 = sand.u32 1, %s1436_s13  }
 0x49a   : > { %s1008_s28 = scalar_lea.sflag [#allocation4], %s1007_s25 }
 0x49b   : > { %p1293_p10 = pnand %p1298_p9, %p1552_p6 }
 0x49d   : > { %p1294_p11 = pneg %p1293_p10 }
 0x49f   : > { %1431 = dma.done.wait (%p1294_p11), %s1008_s28, 256  }
 0x4a0   : > { %1433 = vsyncadd (%p1294_p11), %s1008_s28, 4294967040  ;;  %p21_p12 = scmp.ge.s32.totalorder %s1535_s19, 4   ;;  %s1723_s13 = smov %s1440_s14 }
 0x4a1   : > { %s1724_s14 = smov %s1444_s15  ;;  %s1725_s15 = smov %s1546_s22 }
 0x4a2   : > { %s1726_s16 = smov %s1535_s19  ;;  %23 = sbr.rel (!%p21_p12) target bundleno = 4 (0x4), region = 103 }
 0x4a7   :  { %1014 = vsyncpa [#allocation3], 1 }
 0x4a8   :  { %1016 = vsyncpa [#allocation3 + $0x1], 1 }
 0x4a9   :  { %1017 = vsyncpa [#allocation4], 1 }
 0x4aa   :  { %1019 = vsyncpa [#allocation4 + $0x1], 1 }

</bundles_post_ra>
